<compile_context>
chip_gen: v6e
topology: v6e:2x2x1
jax: 0.10.0
libtpu: 0.0.40
codegen_flags: <defaults>
</compile_context>

<pallas_src>
import jax
import jax.numpy as jnp
from jax import lax
from jax.experimental import pallas as pl
from jax.experimental.pallas import tpu as pltpu

LANES = 128
MAX_TILE_ROWS = 4096                    # 4096 x 128 x 4 B = 2 MiB per f32 tile
FUSED_VMEM_BUDGET = 8 * 1024 * 1024     # single fused kernel if working set fits
VMEM_LIMIT_BYTES = 32 * 1024 * 1024     # > v5e 16 MiB scoped default, < v7x 64 MiB phys
NUM_CORES = 2                           # pass-1 partial-sum split; no-op on 1-TC chips


def _cdiv(a: int, b: int) -> int:
    return -(-a // b)


def _round_up(a: int, b: int) -> int:
    return _cdiv(a, b) * b


def _valid_mask(shape, row_offset, rows, last_cols):
    """Mask of elements whose flat index is < n, for a tile whose first row is
    `row_offset` of the (rows, 128) layout; the final row holds `last_cols`
    valid lanes.  Row-based compare (no flat index -> no i32 overflow)."""
    r = lax.broadcasted_iota(jnp.int32, shape, 0) + row_offset
    l = lax.broadcasted_iota(jnp.int32, shape, 1)
    return (r < rows - 1) | ((r == rows - 1) & (l < last_cols))


def my_softmax(x: jax.Array) -> jax.Array:
    """exp(x) / exp(x).sum()  -- global-sum softmax matching MySoftmax.forward."""
    orig_shape = x.shape
    n = int(x.size)
    out_dtype = x.dtype if jnp.issubdtype(x.dtype, jnp.floating) else jnp.float32
    itemsize = jnp.dtype(x.dtype).itemsize
    out_itemsize = jnp.dtype(out_dtype).itemsize
    # sublane packing quantum: 8 rows (4-byte), 16 (2-byte), 32 (1-byte) dtypes
    sub = max(8, 32 // itemsize)

    # ---- lane-dense (rows, 128) layout -------------------------------------
    rows = _cdiv(n, LANES)
    padded_n = rows * LANES
    last_cols = n - (rows - 1) * LANES          # valid lanes in the final row

    xf = x.reshape(-1)
    if padded_n != n:
        # Only when n % 128 != 0.  Zero padding (dtype-safe); padded elements are
        # masked out in-kernel so the pad value never reaches the global sum.
        # TODO(synk): this jnp.pad (and the trailing [:n]) each cost one extra
        # full-array copy for lane-ragged sizes; avoidable only with manual DMA.
        xf = jnp.pad(xf, (0, padded_n - n))
    x2d = xf.reshape(rows, LANES)

    # ========================================================================
    # Fused fast path: whole array resident in VMEM -> one kernel, 2N traffic.
    # ========================================================================
    fused_bytes = rows * LANES * (itemsize + out_itemsize + 8)   # x + out + f32 temps
    if fused_bytes <= FUSED_VMEM_BUDGET:
        mask_needed = padded_n != n

        def fused_kernel(x_ref, o_ref):
            e = jnp.exp(x_ref[...].astype(jnp.float32))
            if mask_needed:
                e = jnp.where(_valid_mask(e.shape, 0, rows, last_cols), e, 0.0)
            inv = 1.0 / jnp.sum(e)              # exact scalar divide, once
            o_ref[...] = (e * inv).astype(o_ref.dtype)

        out2d = pl.pallas_call(
            fused_kernel,
            out_shape=jax.ShapeDtypeStruct((rows, LANES), out_dtype),
            grid=(1,),
            in_specs=[pl.BlockSpec((rows, LANES), lambda i: (0, 0))],
            out_specs=pl.BlockSpec((rows, LANES), lambda i: (0, 0)),
            compiler_params=pltpu.CompilerParams(
                vmem_limit_bytes=VMEM_LIMIT_BYTES),
            cost_estimate=pl.CostEstimate(
                flops=2 * n, transcendentals=n,
                bytes_accessed=n * (itemsize + out_itemsize)),
        )(x2d)
        out_flat = out2d.reshape(-1)
        if padded_n != n:
            out_flat = out_flat[:n]
        return out_flat.reshape(orig_shape)

    # ========================================================================
    # Streaming two-pass path (3N HBM traffic).
    # ========================================================================
    tile_rows = min(MAX_TILE_ROWS, _round_up(rows, sub))
    num_tiles = _cdiv(rows, tile_rows)
    # in-kernel element mask needed if the tile grid over-covers n
    mask_needed = (num_tiles * tile_rows * LANES) != n

    tiles_per_core = _cdiv(num_tiles, NUM_CORES)
    clamp_needed = tiles_per_core * NUM_CORES != num_tiles

    # ---- pass 1: per-core (8,128) partial sums of exp(x) --------------------
    def sum_exp_kernel(x_ref, part_ref):
        c = pl.program_id(0)
        j = pl.program_id(1)

        @pl.when(j == 0)
        def _():
            part_ref[...] = jnp.zeros_like(part_ref)

        tile_id = c * tiles_per_core + j

        def accumulate():
            e = jnp.exp(x_ref[...].astype(jnp.float32))
            if mask_needed:
                e = jnp.where(
                    _valid_mask(e.shape, tile_id * tile_rows, rows, last_cols),
                    e, 0.0)
            # vreg-shaped (8,128) partial: leading-dim reduce = plain VPU adds;
            # keeps the XLU scalar-reduce chain out of the steady state.
            part_ref[...] += e.reshape(tile_rows // 8, 8, LANES).sum(axis=0)

        if clamp_needed:
            # tail tiles past num_tiles are duplicates of the last tile (clamped
            # DMA below); skip their contribution.
            pl.when(tile_id < num_tiles)(accumulate)
        else:
            accumulate()

    if clamp_needed:
        x_index_map = lambda c, j: (
            jnp.minimum(c * tiles_per_core + j, num_tiles - 1), 0)
    else:
        x_index_map = lambda c, j: (c * tiles_per_core + j, 0)

    partials = pl.pallas_call(
        sum_exp_kernel,
        out_shape=jax.ShapeDtypeStruct((NUM_CORES * 8, LANES), jnp.float32),
        grid=(NUM_CORES, tiles_per_core),
        in_specs=[pl.BlockSpec((tile_rows, LANES), x_index_map)],
        out_specs=pl.BlockSpec((8, LANES), lambda c, j: (c, 0)),
        compiler_params=pltpu.CompilerParams(
            dimension_semantics=("parallel", "arbitrary"),
            vmem_limit_bytes=VMEM_LIMIT_BYTES),
        cost_estimate=pl.CostEstimate(
            flops=2 * n, transcendentals=n,
            bytes_accessed=n * itemsize + NUM_CORES * 8 * LANES * 4),
    )(x2d)

    # ---- pass 2: out = exp(x) * (1 / total), total computed in-kernel -------
    def scale_kernel(part_ref, x_ref, o_ref):
        inv = 1.0 / jnp.sum(part_ref[...])       # tiny reduce + exact divide, hidden
        e = jnp.exp(x_ref[...].astype(jnp.float32))
        o_ref[...] = (e * inv).astype(o_ref.dtype)

    out2d = pl.pallas_call(
        scale_kernel,
        out_shape=jax.ShapeDtypeStruct((rows, LANES), out_dtype),
        grid=(num_tiles,),
        in_specs=[
            pl.BlockSpec((NUM_CORES * 8, LANES), lambda i: (0, 0)),   # partial sums
            pl.BlockSpec((tile_rows, LANES), lambda i: (i, 0)),       # x tiles
        ],
        out_specs=pl.BlockSpec((tile_rows, LANES), lambda i: (i, 0)),
        compiler_params=pltpu.CompilerParams(
            dimension_semantics=("parallel",),
            vmem_limit_bytes=VMEM_LIMIT_BYTES),
        cost_estimate=pl.CostEstimate(
            flops=2 * n, transcendentals=n,
            bytes_accessed=n * itemsize + n * out_itemsize),
    )(partials, x2d)

    out_flat = out2d.reshape(-1)
    if padded_n != n:
        out_flat = out_flat[:n]
    return out_flat.reshape(orig_shape)


if __name__ == "__main__":
    key = jax.random.PRNGKey(0)
    k1, k2 = jax.random.split(key)

    # Primary demo input (fused single-kernel path), NCHW-style shape.
    x = jax.random.normal(k1, (2, 4, 16, 16), dtype=jnp.float32)
    out = jax.block_until_ready(my_softmax(x))
    ref = jnp.exp(x) / jnp.sum(jnp.exp(x))
    assert out.shape == x.shape and out.dtype == x.dtype
    assert jnp.allclose(out, ref, rtol=1e-5, atol=1e-6), "fused path mismatch"

    # Larger ragged input exercising the streaming two-pass path:
    # padding + in-kernel mask + dual-core pass-1 split (2 tiles of 4096 rows).
    x2 = jax.random.normal(k2, (1048526,), dtype=jnp.float32)
    out2 = jax.block_until_ready(my_softmax(x2))
    ref2 = jnp.exp(x2) / jnp.sum(jnp.exp(x2))
    assert out2.shape == x2.shape and out2.dtype == x2.dtype
    assert jnp.allclose(out2, ref2, rtol=1e-4, atol=1e-10), "streaming path mismatch"

    print("KERNEL_OK")
</pallas_src>

<mosaic_0001>
module attributes {stable_mosaic.version = 11 : i64} {
  func.func @fused_kernel(%arg0: i32, %arg1: memref<16x128xf32, #tpu.memory_space<vmem>>, %arg2: memref<16x128xf32, #tpu.memory_space<vmem>>) attributes {dimension_semantics = [#tpu.dimension_semantics<arbitrary>], iteration_bounds = array<i64: 1>, scalar_prefetch = 0 : i64, scratch_operands = 0 : i64, tpu.core_type = #tpu.core_type<tc>, window_params = [{pipeline_mode = #tpu.pipeline_mode<synchronous>, transform_indices = @transform_0, window_bounds = array<i64: 16, 128>}, {pipeline_mode = #tpu.pipeline_mode<synchronous>, transform_indices = @transform_1, window_bounds = array<i64: 16, 128>}]} {
    %c0 = arith.constant 0 : index
    %c0_0 = arith.constant 0 : index
    %0 = vector.load %arg1[%c0, %c0_0] : memref<16x128xf32, #tpu.memory_space<vmem>>, vector<16x128xf32>
    %1 = math.exp %0 : vector<16x128xf32>
    %2 = vector.shape_cast %1 : vector<16x128xf32> to vector<1x16x128xf32>
    %cst = arith.constant dense<0.000000e+00> : vector<1xf32>
    %3 = vector.multi_reduction <add>, %2, %cst [1, 2] : vector<1x16x128xf32> to vector<1xf32>
    %4 = vector.shape_cast %3 : vector<1xf32> to vector<1x1x1xf32>
    %5 = vector.extract %4[0, 0, 0] : f32 from vector<1x1x1xf32>
    %cst_1 = arith.constant 1.000000e+00 : f32
    %6 = arith.divf %cst_1, %5 : f32
    %7 = vector.broadcast %6 : f32 to vector<16x128xf32>
    %8 = arith.mulf %1, %7 : vector<16x128xf32>
    %c0_2 = arith.constant 0 : index
    %c0_3 = arith.constant 0 : index
    %9 = vector.load %arg2[%c0_2, %c0_3] : memref<16x128xf32, #tpu.memory_space<vmem>>, vector<16x128xf32>
    tpu.vector_store %arg2[%c0_2, %c0_3], %8 {strides = array<i32>} : memref<16x128xf32, #tpu.memory_space<vmem>>, vector<16x128xf32>,
    return
  }
  func.func @transform_0(%arg0: i32) -> (i32, i32) {
    %c0_i32 = arith.constant 0 : i32
    %c0_i32_0 = arith.constant 0 : i32
    %c0_i32_1 = arith.constant 0 : i32
    return %c0_i32, %c0_i32_0 : i32, i32
  }
  func.func @transform_1(%arg0: i32) -> (i32, i32) {
    %c0_i32 = arith.constant 0 : i32
    %c0_i32_0 = arith.constant 0 : i32
    %c0_i32_1 = arith.constant 0 : i32
    return %c0_i32, %c0_i32_0 : i32, i32
  }
}

</mosaic_0001>

<bundles_post_ra>
// kernel: tpu_custom_call.1
= control target key start
LH: loop header
LB: loop body
LE: loop exit
PB: predicated region body
PF: predicated region fallthrough
CT: control target
= control target key end

     0   :  { %6 = vsyncpa [#allocation3], 0  ;;  %s148_s0 = inlined_call_operand.hbm [shape: f32[16,128], index: 0, kind: input, shape index: {}]   ;;  %s149_s1 = inlined_call_operand.hbm [shape: f32[16,128], index: 1, kind: output, shape index: {}]  }
   0x1   :  { %7 = vsyncpa [#allocation4], 0  ;;  %s122_s6 = smov [#allocation2]  }
   0x2   :  { %s13_s7 = sshll.u32 %s122_s6, 4  ;;  %s14_s7 = int_to_ptr.vmem [resolvable:$true] %s13_s7 }
   0x3   :  { %s86_s8 = scalar_lea.vmem %s14_s7, 256  ;;  %p91_p1 = scmp.lt.s32.totalorder %s14_s7, %s14_s7 }
   0x4   :  { %p87_p0 = scmp.ne.s32.totalorder %s14_s7, %s86_s8  ;;  %p92_p2 = scmp.lt.s32.totalorder %s86_s8, %s86_s8 }
   0x6   :  { %p93_p3 = por %p92_p2, %p91_p1 }
   0x8   :  { %p94_p4 = pnand %p93_p3, %p87_p0 }
   0xa   :  { %97 = shalt.err (!%p94_p4)
}
   0xb   :  { %s123_s9 = smov 128   ;;  %s124_s10 = smov 8  }
   0xc   :  { %19 = dma.hbm_to_vmem [thread:$0]  %s148_s0, 256, %s14_s7, [#allocation3], %s123_s9, %s123_s9, %s124_s10  }
   0xd   :  { %118 = dma.done.wait [#allocation3], 256  }
   0xe   :  { %119 = vsyncadd [#allocation3], 4294967040  ;;  %v23_v0 = vld [vmem:[#allocation2] sm:$0xff]  ;;  %v24_v1 = vld [vmem:[#allocation2 + $0x8] sm:$0xff]  ;;  %s125_s13 = smov [#allocation5]  }
   0xf   :  { %v25_v2 = vmul.f32 1.442695, %v23_v0  ;;  %v27_v3 = vmul.f32 1.442695, %v24_v1  ;;  %s52_s14 = sshll.u32 %s125_s13, 4  ;;  %s53_s14 = int_to_ptr.vmem [resolvable:$true] %s52_s14 }
  0x10   :  { %s98_s16 = scalar_lea.vmem %s53_s14, 256  ;;  %p103_p6 = scmp.lt.s32.totalorder %s53_s14, %s53_s14 }
  0x11   :  { %72 = vpow2.f32 %v25_v2  ;;  %p99_p5 = scmp.ne.s32.totalorder %s53_s14, %s98_s16  ;;  %p104_p7 = scmp.lt.s32.totalorder %s98_s16, %s98_s16 }
  0x12   :  { %74 = vpow2.f32 %v27_v3 }
  0x13   :  { %p105_p8 = por %p104_p7, %p103_p6 }
  0x15   :  { %p106_p9 = pnand %p105_p8, %p99_p5 }
  0x1e   :  { %v73_v4 = vpop.eup %72 }
  0x1f   :  { %v75_v5 = vpop.eup %74 }
  0x20   :  { %v29_v6 = vadd.f32 %v75_v5, %v73_v4 }
  0x22   :  { %30 = vadd.xlane.f32.xlu0 %v29_v6 }
  0xab   :  { %v31_v7 = vpop.xlane.xlu0 %30 }
  0xac   :  { %v32_v8 = vrot.slane %v31_v7, 4 }
  0xae   :  { %v33_v9 = vadd.f32 %v32_v8, %v31_v7 }
  0xb0   :  { %v34_v10 = vrot.slane %v33_v9, 2 }
  0xb2   :  { %v35_v11 = vadd.f32 %v34_v10, %v33_v9 }
  0xb4   :  { %v36_v12 = vrot.slane %v35_v11, 1 }
  0xb6   :  { %v37_v13 = vadd.f32 %v36_v12, %v35_v11 }
  0xb8   :  { %64 = vpush %v37_v13 }
  0xe9   :  { %s65_s0 = spop %64 }
  0xea   :  { %v39_v14 = vstv %s65_s0 }
  0xeb   :  { %76 = vrcp.f32 %v39_v14 }
  0xf8   :  { %v77_v15 = vpop.eup %76 }
  0xf9   :  { %66 = vpush %v77_v15 }
 0x12a   :  { %s67_s15 = spop %66 }
 0x12b   :  { %v42_v16 = vstv %s67_s15 }
 0x12c   :  { %v43_v17 = vmul.f32 %v73_v4, %v42_v16  ;;  %v44_v18 = vmul.f32 %v75_v5, %v42_v16 }
 0x12e   :  { %45 = vst [vmem:[#allocation5] sm:$0xff] %v43_v17  ;;  %46 = vst [vmem:[#allocation5 + $0x8] sm:$0xff] %v44_v18 }
 0x12f   :  { %109 = shalt.err (!%p106_p9)
}
 0x130   :  { %58 = dma.vmem_to_hbm [thread:$0]  %s53_s14, 256, %s149_s1, [#allocation4], %s123_s9, %s123_s9, %s124_s10  }
 0x131   :  { %120 = dma.done.wait [#allocation4], 256  }
 0x132   :  { %121 = vsyncadd [#allocation4], 4294967040 }
 0x133   :  { %62 = vsyncpa [#allocation3], 1 }
 0x134   :  { %63 = vsyncpa [#allocation4], 1 }

</bundles_post_ra>
